<compile_context>
chip_gen: v7x
topology: tpu7x:2x2x1
jax: 0.10.0
libtpu: 0.0.40
codegen_flags: <defaults>
</compile_context>

<pallas_src>
import math
from functools import partial

import jax
import jax.numpy as jnp
import numpy as np
from jax.experimental import pallas as pl
from jax.experimental.pallas import tpu as pltpu

# ------------------------- static config (mirrors module defaults) -------------------
GRAD_ORDER = 6          # Taylor expansion order
GRAD_ORDER_MIN = 4      # orders above this are masked where |delta| > threshold
DELTA_THD = 2.5         # delta_hidden_state_thd
SELECT_DIM = 4          # number of Taylor-approximated intermediate dims


def _round_up(a, b):
    return (a + b - 1) // b * b


def silu(x):
    return x * jax.nn.sigmoid(x)


def _silu_derivatives(points, order):
    """k-th derivatives (k = 1..order) of SiLU at `points` -> [len(points), order]."""
    g = lambda x: x * jax.nn.sigmoid(x)
    cols = []
    for _ in range(order):
        g = jax.grad(g)
        cols.append(jax.vmap(g)(points))
    return jnp.stack(cols, axis=-1)


# --------------------------------- Pallas kernel -------------------------------------
def _taylor_mlp_kernel(x_ref, upgate_T_ref, lp_ref, tdown_T_ref,
                       ffn_upgate_T_ref, ffn_down_T_ref, out_ref,
                       xb_ref, acc_ref,
                       *, sel, grad_order, grad_order_min, delta_thd, tf):
    f = pl.program_id(1)
    nf = pl.num_programs(1)

    @pl.when(f == 0)
    def _init():
        x = x_ref[...]                                     # [tm, H] f32
        # bf16 copy of x, cast once per M tile and reused for every F step.
        xb_ref[...] = x.astype(jnp.bfloat16)

        # ---- Taylor-approximated branch (f32, threshold sensitive), once per M tile ----
        ug = jnp.dot(x, upgate_T_ref[...], preferred_element_type=jnp.float32)  # [tm, 2*sel]
        up = ug[:, :sel]                                                        # [tm, sel]
        g1 = ug[:, sel:]                                                        # [tm, sel]
        delta = g1 - lp_ref[...]                                                # [tm, sel]
        keep = (jnp.abs(delta) <= delta_thd).astype(jnp.float32)                # 1 - over_act_mask

        # Build all (GO+1) term blocks and do ONE K=(GO+1)*sel down-projection.
        cols = [up]
        t = jnp.ones_like(delta)
        for idx in range(grad_order):                 # small & static: fully unrolled
            k = idx + 1
            t = t * delta * (1.0 / float(k))          # delta^k / k!  (sign exact)
            col = t * up
            if k > grad_order_min:
                col = col * keep
            cols.append(col)
        terms = jnp.concatenate(cols, axis=1)         # [tm, (GO+1)*sel]
        acc_ref[...] = jnp.dot(terms, tdown_T_ref[...],
                               preferred_element_type=jnp.float32)              # [tm, H]

    # ---- exact FFN branch on this F tile: fused gate/up matmul, bf16 MXU, f32 acc ----
    xb = xb_ref[...]                                                            # [tm, H] bf16
    gu = jnp.dot(xb, ffn_upgate_T_ref[...], preferred_element_type=jnp.float32)  # [tm, 2*tf]
    gate = gu[:, :tf]
    upf = gu[:, tf:]
    # SiLU; clamp the exp argument so gate << 0 cannot generate inf -> NaN.
    z = jnp.exp(jnp.minimum(-gate, 80.0))
    act = gate * pl.reciprocal(1.0 + z, approx=True)
    acc_ref[...] = acc_ref[...] + jnp.dot((act * upf).astype(jnp.bfloat16),
                                          ffn_down_T_ref[...],
                                          preferred_element_type=jnp.float32)   # [tm, H]

    @pl.when(f == nf - 1)
    def _finalize():
        out_ref[...] = acc_ref[...].astype(out_ref.dtype)


# --------------------------- one-time weight preparation ------------------------------
def prepare_taylor_mlp_weights(params, *, tf=512):
    """Hoisted weight prep: transpose / bf16 cast / pad / gate-up fusion. Call once."""
    sel = int(params["up_proj_weight"].shape[0])
    F = int(params["ffn_up_proj_weight"].shape[0])
    H = int(params["ffn_up_proj_weight"].shape[1])
    GO = int(params["fuse_weight"].shape[-1])

    # Taylor-branch weights (tiny; kept f32 because |delta|>thd mask is threshold sensitive).
    upgate_T = jnp.concatenate(
        [params["up_proj_weight"], params["gate_proj_weight"]], axis=0
    ).T.astype(jnp.float32)                                               # [H, 2*sel]
    lp = params["local_point"].reshape(1, sel).astype(jnp.float32)        # [1, sel]
    lao_T = params["local_approx_output"].T.astype(jnp.float32)           # [sel, H]
    fuse_T = jnp.transpose(params["fuse_weight"], (2, 1, 0)).astype(jnp.float32)  # [GO, sel, H]
    tdown_T = jnp.concatenate([lao_T[None], fuse_T], axis=0).reshape((GO + 1) * sel, H)

    # FFN weights: bf16 MXU operands, pre-transposed to [in, out], gate/up fused per F tile.
    tf = min(_round_up(tf, 128), _round_up(F, 128))
    Fp = _round_up(F, tf)
    gate_T = params["ffn_gate_proj_weight"].T.astype(jnp.bfloat16)        # [H, F]
    up_T = params["ffn_up_proj_weight"].T.astype(jnp.bfloat16)            # [H, F]
    down_T = params["ffn_down_proj_weight"].T.astype(jnp.bfloat16)        # [F, H]
    if Fp != F:                                       # zero pad: zero cols/rows contribute 0
        padF = Fp - F
        gate_T = jnp.pad(gate_T, ((0, 0), (0, padF)))
        up_T = jnp.pad(up_T, ((0, 0), (0, padF)))
        down_T = jnp.pad(down_T, ((0, padF), (0, 0)))
    nft = Fp // tf
    g3 = gate_T.reshape(H, nft, tf)
    u3 = up_T.reshape(H, nft, tf)
    ffn_upgate = jnp.transpose(jnp.concatenate([g3, u3], axis=2), (1, 0, 2))  # [nft, H, 2*tf]

    return dict(upgate_T=upgate_T, lp=lp, tdown_T=tdown_T,
                ffn_upgate=ffn_upgate, ffn_down_T=down_T,
                sel=sel, GO=GO, F=F, Fp=Fp, H=H, tf=tf)


def _est_vmem_bytes(tm, tf, H, sel, go, out_itemsize):
    """Rough VMEM footprint estimate (double-buffered inputs + scratch)."""
    x_in = 2 * tm * H * 4                 # f32 x, double-buffered
    xb = tm * H * 2                       # bf16 x scratch
    acc = tm * H * 4                      # f32 accumulator scratch
    outb = 2 * tm * H * out_itemsize      # output block, double-buffered
    w_ug = 2 * H * (2 * tf) * 2           # fused gate/up tile, bf16, double-buffered
    w_dn = 2 * tf * H * 2                 # down tile, bf16, double-buffered
    taylor = 2 * (H * 2 * sel + (go + 1) * sel * H + sel) * 4
    return x_in + xb + acc + outb + w_ug + w_dn + taylor


# --------------------------------- forward wrapper ------------------------------------
def taylor_mlp_forward(hidden_states, prepped, *, tm=512, vmem_limit_bytes=None):
    B, S, H = hidden_states.shape
    assert H == prepped["H"]
    M = B * S
    out_dtype = hidden_states.dtype
    out_itemsize = jnp.dtype(out_dtype).itemsize
    x = hidden_states.reshape(M, H).astype(jnp.float32)

    sel, GO, Fp, tf = prepped["sel"], prepped["GO"], prepped["Fp"], prepped["tf"]

    # VMEM limit: leave headroom below physical capacity (v7x has only 64 MiB per core).
    if vmem_limit_bytes is None:
        try:
            cap = int(pltpu.get_tpu_info().vmem_capacity_bytes)
        except Exception:
            cap = 64 * 1024 * 1024        # conservative fallback (safe on all generations)
        vmem_limit_bytes = min(int(0.85 * cap), 100 * 1024 * 1024)

    # Tile over M: multiple of 8, big enough to be compute-bound, small enough for VMEM.
    tm = max(8, min(_round_up(tm, 8), _round_up(M, 8)))
    while tm > 64 and _est_vmem_bytes(tm, tf, H, sel, GO, out_itemsize) > int(0.9 * vmem_limit_bytes):
        tm = max(64, _round_up(tm // 2, 8))
    # Megacore hint: with enough rows, make sure there are >= 2 M tiles (both TensorCores busy).
    if M >= 256 and -(-M // tm) < 2:
        tm = _round_up(-(-M // 2), 8)
    Mp = _round_up(M, tm)
    if Mp != M:
        x = jnp.pad(x, ((0, Mp - M), (0, 0)))

    nft = Fp // tf
    grid = (Mp // tm, nft)
    n_m_tiles = Mp // tm

    kernel = partial(
        _taylor_mlp_kernel,
        sel=sel, grad_order=GO, grad_order_min=GRAD_ORDER_MIN,
        delta_thd=DELTA_THD, tf=tf,
    )

    flops = (2 * Mp * H * (2 * sel)                  # Taylor up/gate projections
             + 2 * Mp * ((GO + 1) * sel) * H         # collapsed Taylor down projection
             + 2 * Mp * H * (2 * Fp)                 # fused ffn gate/up projection
             + 2 * Mp * Fp * H)                      # ffn down projection
    ffn_w_bytes = (2 * H * Fp + Fp * H) * 2          # bf16 ffn weights
    taylor_w_bytes = (H * 2 * sel + (GO + 1) * sel * H + sel) * 4
    bytes_accessed = (Mp * H * 4                     # x (f32, read once)
                      + Mp * H * out_itemsize        # output writeback
                      + n_m_tiles * (ffn_w_bytes + taylor_w_bytes))  # weights per M tile
    cost = pl.CostEstimate(flops=int(flops),
                           transcendentals=int(Mp * Fp),   # exp in sigmoid
                           bytes_accessed=int(bytes_accessed))

    upgate_T = prepped["upgate_T"]
    lp = prepped["lp"]
    tdown_T = prepped["tdown_T"]
    ffn_upgate = prepped["ffn_upgate"]
    ffn_down_T = prepped["ffn_down_T"]

    out = pl.pallas_call(
        kernel,
        out_shape=jax.ShapeDtypeStruct((Mp, H), out_dtype),
        grid=grid,
        in_specs=[
            pl.BlockSpec((tm, H), lambda i, f: (i, 0)),                 # x (f32)
            pl.BlockSpec(upgate_T.shape, lambda i, f: (0, 0)),          # [H, 2*sel]
            pl.BlockSpec(lp.shape, lambda i, f: (0, 0)),                # [1, sel]
            pl.BlockSpec(tdown_T.shape, lambda i, f: (0, 0)),           # [(GO+1)*sel, H]
            pl.BlockSpec((None, H, 2 * tf), lambda i, f: (f, 0, 0)),    # fused gate/up tile
            pl.BlockSpec((tf, H), lambda i, f: (f, 0)),                 # ffn down tile
        ],
        out_specs=pl.BlockSpec((tm, H), lambda i, f: (i, 0)),
        scratch_shapes=[
            pltpu.VMEM((tm, H), jnp.bfloat16),   # xb (x cast once per M tile)
            pltpu.VMEM((tm, H), jnp.float32),    # f32 accumulator
        ],
        compiler_params=pltpu.CompilerParams(
            dimension_semantics=("parallel", "arbitrary"),
            vmem_limit_bytes=int(vmem_limit_bytes),
        ),
        cost_estimate=cost,
    )(x, upgate_T, lp, tdown_T, ffn_upgate, ffn_down_T)

    return out[:M].reshape(B, S, H)


# ------------------------- deterministic parameter construction ----------------------
def init_params(key, hidden_size, intermediate_size,
                select_dim=SELECT_DIM, grad_order=GRAD_ORDER):
    ks = jax.random.split(key, 6)
    gate_w = jax.random.normal(ks[0], (intermediate_size, hidden_size), jnp.float32) * 0.05
    up_w = jax.random.normal(ks[1], (intermediate_size, hidden_size), jnp.float32) * 0.05
    down_w = jax.random.normal(ks[2], (hidden_size, intermediate_size), jnp.float32) * 0.05

    # synthetic per-intermediate-dim calibration stats (hidden_states_max / min)
    hmax = jax.random.uniform(ks[3], (intermediate_size,), jnp.float32, 0.5, 3.0)
    hmin = -jax.random.uniform(ks[4], (intermediate_size,), jnp.float32, 0.5, 3.0)
    gap = hmax - hmin

    # TODO(synk): original dim_selection() is external code; deterministic stand-in =
    # pick the `select_dim` dims with the smallest max-min gap, rest go to the exact FFN.
    order = jnp.argsort(gap)
    sampled_dim = jnp.sort(order[:select_dim])
    ffn_dim = jnp.sort(order[select_dim:])

    local_min = hmin[sampled_dim]
    local_max = hmax[sampled_dim]
    local_point = (local_min + local_max) / 2.0

    perturb = jax.random.bernoulli(ks[5], 0.5, (select_dim,)).astype(jnp.float32) * 2.0 - 1.0

    down_sampled = down_w[:, sampled_dim]                                  # [H, sel]
    local_approx_output = silu(local_point)[None, :] * down_sampled        # [H, sel]

    grad_matrix = _silu_derivatives(local_point, grad_order)               # [sel, GO]
    discount_factor = jnp.array([math.lgamma(m + 1) for m in range(1, grad_order + 1)],
                                jnp.float32)
    grad_order_buf = jnp.arange(1, grad_order + 1)
    fuse_weight = down_sampled[:, :, None] * grad_matrix[None, :, :]       # [H, sel, GO]

    # weight_perturb()
    gate_sampled = gate_w[sampled_dim, :] * perturb[:, None]
    local_point_p = local_point * perturb
    # perturb is +-1, so perturb**k == perturb for odd k, 1 for even k.
    perturb_rev = jnp.where((grad_order_buf[None, :] % 2) == 1, perturb[:, None], 1.0)
    fuse_weight = fuse_weight * perturb_rev[None, :, :]

    return dict(
        up_proj_weight=up_w[sampled_dim, :],          # [sel, H]
        gate_proj_weight=gate_sampled,                # [sel, H] (perturbed)
        local_point=local_point_p,                    # [sel]    (perturbed)
        local_approx_output=local_approx_output,      # [H, sel]
        discount_factor=discount_factor,              # [GO]
        fuse_weight=fuse_weight,                      # [H, sel, GO]
        ffn_gate_proj_weight=gate_w[ffn_dim, :],      # [F, H]
        ffn_up_proj_weight=up_w[ffn_dim, :],          # [F, H]
        ffn_down_proj_weight=down_w[:, ffn_dim],      # [H, F]
    )


# ------------------------------- pure-JAX reference ----------------------------------
def reference_forward(hidden_states, params):
    """Matches the torch module's forward_log_exp (f32)."""
    up = hidden_states @ params["up_proj_weight"].T
    g1 = hidden_states @ params["gate_proj_weight"].T
    delta = g1 - params["local_point"]
    neg = (delta > 0).astype(jnp.float32) * 2 - 1
    dabs = jnp.abs(delta)
    logd = jnp.log(dabs)
    over = (dabs > DELTA_THD).astype(jnp.float32)
    out = up @ params["local_approx_output"].T
    for idx in range(GRAD_ORDER):
        k = idx + 1
        term = jnp.exp(logd * k - params["discount_factor"][idx])
        if k % 2 == 1:
            term = term * neg
        tmp = term * up
        if k > GRAD_ORDER_MIN:
            tmp = tmp * (1.0 - over)
        out = out + tmp @ params["fuse_weight"][:, :, idx].T
    upf = hidden_states @ params["ffn_up_proj_weight"].T
    gate = hidden_states @ params["ffn_gate_proj_weight"].T
    ffn = (silu(gate) * upf) @ params["ffn_down_proj_weight"].T
    return out + ffn


if __name__ == "__main__":
    key = jax.random.PRNGKey(0)
    # batch, seq, hidden_size, intermediate_size (4 Taylor dims + 256 exact FFN dims)
    B, S, H, I = 2, 8, 32, 260
    k_param, k_x = jax.random.split(key)

    params = init_params(k_param, H, I)
    hidden_states = jax.random.normal(k_x, (B, S, H), jnp.float32)

    # One-time weight prep (hoisted out of the hot path). tf=128 -> 2 F tiles so the
    # scratch-accumulator / last-step-writeback path is exercised.
    prepped = prepare_taylor_mlp_weights(params, tf=128)

    out = taylor_mlp_forward(hidden_states, prepped, tm=256)
    out = jax.block_until_ready(out)

    ref = reference_forward(hidden_states, params)
    # bf16 matmul operands on the FFN branch -> slightly looser tolerance than pure f32.
    np.testing.assert_allclose(np.asarray(out), np.asarray(ref), rtol=1e-2, atol=1e-2)
    print("KERNEL_OK")
</pallas_src>

<mosaic_0001>
module attributes {stable_mosaic.version = 11 : i64} {
  func.func @_taylor_mlp_kernel(%arg0: i32, %arg1: i32, %arg2: memref<16x32xf32, #tpu.memory_space<vmem>>, %arg3: memref<32x8xf32, #tpu.memory_space<vmem>>, %arg4: memref<1x4xf32, #tpu.memory_space<vmem>>, %arg5: memref<28x32xf32, #tpu.memory_space<vmem>>, %arg6: memref<1x32x256xbf16, #tpu.memory_space<vmem>>, %arg7: memref<128x32xbf16, #tpu.memory_space<vmem>>, %arg8: memref<16x32xf32, #tpu.memory_space<vmem>>, %arg9: memref<16x32xbf16, #tpu.memory_space<vmem>>, %arg10: memref<16x32xf32, #tpu.memory_space<vmem>>) attributes {dimension_semantics = [#tpu.dimension_semantics<parallel>, #tpu.dimension_semantics<arbitrary>], iteration_bounds = array<i64: 1, 2>, scalar_prefetch = 0 : i64, scratch_operands = 2 : i64, tpu.core_type = #tpu.core_type<tc>, window_params = [{transform_indices = @transform_0, window_bounds = array<i64: 16, 32>}, {pipeline_mode = #tpu.pipeline_mode<synchronous>, transform_indices = @transform_1, window_bounds = array<i64: 32, 8>}, {pipeline_mode = #tpu.pipeline_mode<synchronous>, transform_indices = @transform_2, window_bounds = array<i64: 1, 4>}, {pipeline_mode = #tpu.pipeline_mode<synchronous>, transform_indices = @transform_3, window_bounds = array<i64: 28, 32>}, {transform_indices = @transform_4, window_bounds = array<i64: 1, 32, 256>}, {transform_indices = @transform_5, window_bounds = array<i64: 128, 32>}, {transform_indices = @transform_6, window_bounds = array<i64: 16, 32>}]} {
    %c0_i32 = arith.constant 0 : i32
    %0 = arith.cmpi eq, %arg1, %c0_i32 : i32
    %1 = arith.extui %0 : i1 to i32
    %c0_i32_0 = arith.constant 0 : i32
    %2 = arith.cmpi ne, %1, %c0_i32_0 : i32
    scf.if %2 {
      %c0_16 = arith.constant 0 : index
      %c0_17 = arith.constant 0 : index
      %28 = vector.load %arg2[%c0_16, %c0_17] : memref<16x32xf32, #tpu.memory_space<vmem>>, vector<16x32xf32>
      %29 = arith.truncf %28 : vector<16x32xf32> to vector<16x32xbf16>
      %c0_18 = arith.constant 0 : index
      %c0_19 = arith.constant 0 : index
      %30 = vector.load %arg9[%c0_18, %c0_19] : memref<16x32xbf16, #tpu.memory_space<vmem>>, vector<16x32xbf16>
      tpu.vector_store %arg9[%c0_18, %c0_19], %29 {strides = array<i32>} : memref<16x32xbf16, #tpu.memory_space<vmem>>, vector<16x32xbf16>,
      %c0_20 = arith.constant 0 : index
      %c0_21 = arith.constant 0 : index
      %31 = vector.load %arg3[%c0_20, %c0_21] : memref<32x8xf32, #tpu.memory_space<vmem>>, vector<32x8xf32>
      %cst_22 = arith.constant dense<0.000000e+00> : vector<16x8xf32>
      %32 = tpu.matmul %28, %31, %cst_22 {dimension_numbers = #tpu.dot_dimension_numbers<[1], [0], [0], [1], [0, 0, 1, 1], [], []>} : vector<16x32xf32>, vector<32x8xf32>, vector<16x8xf32> -> vector<16x8xf32>
      %33 = vector.extract_strided_slice %32 {offsets = [0, 0], sizes = [16, 4], strides = [1, 1]} : vector<16x8xf32> to vector<16x4xf32>
      %34 = vector.extract_strided_slice %32 {offsets = [0, 4], sizes = [16, 4], strides = [1, 1]} : vector<16x8xf32> to vector<16x4xf32>
      %c0_23 = arith.constant 0 : index
      %c0_24 = arith.constant 0 : index
      %35 = vector.load %arg4[%c0_23, %c0_24] : memref<1x4xf32, #tpu.memory_space<vmem>>, vector<1x4xf32>
      %36 = vector.broadcast %35 : vector<1x4xf32> to vector<16x4xf32>
      %37 = arith.subf %34, %36 : vector<16x4xf32>
      %38 = math.absf %37 : vector<16x4xf32>
      %cst_25 = arith.constant 2.500000e+00 : f32
      %39 = vector.broadcast %cst_25 : f32 to vector<16x4xf32>
      %40 = arith.cmpf ole, %38, %39 : vector<16x4xf32>
      %41 = arith.extui %40 : vector<16x4xi1> to vector<16x4xi32>
      %42 = arith.sitofp %41 : vector<16x4xi32> to vector<16x4xf32>
      %cst_26 = arith.constant 1.000000e+00 : f32
      %43 = vector.broadcast %cst_26 : f32 to vector<16x4xf32>
      %44 = arith.mulf %43, %37 : vector<16x4xf32>
      %cst_27 = arith.constant 1.000000e+00 : f32
      %45 = vector.broadcast %cst_27 : f32 to vector<16x4xf32>
      %46 = arith.mulf %44, %45 : vector<16x4xf32>
      %47 = arith.mulf %46, %33 : vector<16x4xf32>
      %48 = arith.mulf %46, %37 : vector<16x4xf32>
      %cst_28 = arith.constant 5.000000e-01 : f32
      %49 = vector.broadcast %cst_28 : f32 to vector<16x4xf32>
      %50 = arith.mulf %48, %49 : vector<16x4xf32>
      %51 = arith.mulf %50, %33 : vector<16x4xf32>
      %52 = arith.mulf %50, %37 : vector<16x4xf32>
      %cst_29 = arith.constant 0.333333343 : f32
      %53 = vector.broadcast %cst_29 : f32 to vector<16x4xf32>
      %54 = arith.mulf %52, %53 : vector<16x4xf32>
      %55 = arith.mulf %54, %33 : vector<16x4xf32>
      %56 = arith.mulf %54, %37 : vector<16x4xf32>
      %cst_30 = arith.constant 2.500000e-01 : f32
      %57 = vector.broadcast %cst_30 : f32 to vector<16x4xf32>
      %58 = arith.mulf %56, %57 : vector<16x4xf32>
      %59 = arith.mulf %58, %33 : vector<16x4xf32>
      %60 = arith.mulf %58, %37 : vector<16x4xf32>
      %cst_31 = arith.constant 2.000000e-01 : f32
      %61 = vector.broadcast %cst_31 : f32 to vector<16x4xf32>
      %62 = arith.mulf %60, %61 : vector<16x4xf32>
      %63 = arith.mulf %62, %33 : vector<16x4xf32>
      %64 = arith.mulf %63, %42 : vector<16x4xf32>
      %65 = arith.mulf %62, %37 : vector<16x4xf32>
      %cst_32 = arith.constant 0.166666672 : f32
      %66 = vector.broadcast %cst_32 : f32 to vector<16x4xf32>
      %67 = arith.mulf %65, %66 : vector<16x4xf32>
      %68 = arith.mulf %67, %33 : vector<16x4xf32>
      %69 = arith.mulf %68, %42 : vector<16x4xf32>
      %70 = tpu.concatenate %33, %47, %51, %55, %59, %64, %69 in 1 : vector<16x4xf32>, vector<16x4xf32>, vector<16x4xf32>, vector<16x4xf32>, vector<16x4xf32>, vector<16x4xf32>, vector<16x4xf32> -> vector<16x28xf32>
      %c0_33 = arith.constant 0 : index
      %c0_34 = arith.constant 0 : index
      %71 = vector.load %arg5[%c0_33, %c0_34] : memref<28x32xf32, #tpu.memory_space<vmem>>, vector<28x32xf32>
      %cst_35 = arith.constant dense<0.000000e+00> : vector<16x32xf32>
      %72 = tpu.matmul %70, %71, %cst_35 {dimension_numbers = #tpu.dot_dimension_numbers<[1], [0], [0], [1], [0, 0, 1, 1], [], []>} : vector<16x28xf32>, vector<28x32xf32>, vector<16x32xf32> -> vector<16x32xf32>
      %c0_36 = arith.constant 0 : index
      %c0_37 = arith.constant 0 : index
      %73 = vector.load %arg10[%c0_36, %c0_37] : memref<16x32xf32, #tpu.memory_space<vmem>>, vector<16x32xf32>
      tpu.vector_store %arg10[%c0_36, %c0_37], %72 {strides = array<i32>} : memref<16x32xf32, #tpu.memory_space<vmem>>, vector<16x32xf32>,
    } else {
    }
    %c0 = arith.constant 0 : index
    %c0_1 = arith.constant 0 : index
    %3 = vector.load %arg9[%c0, %c0_1] : memref<16x32xbf16, #tpu.memory_space<vmem>>, vector<16x32xbf16>
    %c0_2 = arith.constant 0 : index
    %c0_3 = arith.constant 0 : index
    %c0_4 = arith.constant 0 : index
    %4 = vector.load %arg6[%c0_2, %c0_3, %c0_4] : memref<1x32x256xbf16, #tpu.memory_space<vmem>>, vector<1x32x256xbf16>
    %5 = vector.shape_cast %4 : vector<1x32x256xbf16> to vector<32x256xbf16>
    %cst = arith.constant dense<0.000000e+00> : vector<16x256xf32>
    %6 = tpu.matmul %3, %5, %cst {dimension_numbers = #tpu.dot_dimension_numbers<[1], [0], [0], [1], [0, 0, 1, 1], [], []>} : vector<16x32xbf16>, vector<32x256xbf16>, vector<16x256xf32> -> vector<16x256xf32>
    %7 = vector.extract_strided_slice %6 {offsets = [0, 0], sizes = [16, 128], strides = [1, 1]} : vector<16x256xf32> to vector<16x128xf32>
    %8 = vector.extract_strided_slice %6 {offsets = [0, 128], sizes = [16, 128], strides = [1, 1]} : vector<16x256xf32> to vector<16x128xf32>
    %cst_5 = arith.constant 0.000000e+00 : f32
    %9 = vector.broadcast %cst_5 : f32 to vector<16x128xf32>
    %10 = arith.subf %9, %7 : vector<16x128xf32>
    %cst_6 = arith.constant 8.000000e+01 : f32
    %11 = vector.broadcast %cst_6 : f32 to vector<16x128xf32>
    %12 = arith.minimumf %10, %11 : vector<16x128xf32>
    %13 = math.exp %12 : vector<16x128xf32>
    %cst_7 = arith.constant 1.000000e+00 : f32
    %14 = vector.broadcast %cst_7 : f32 to vector<16x128xf32>
    %15 = arith.addf %14, %13 : vector<16x128xf32>
    %16 = tpu.reciprocal %15 {approx = true} : vector<16x128xf32> -> vector<16x128xf32>
    %17 = arith.mulf %7, %16 : vector<16x128xf32>
    %c0_8 = arith.constant 0 : index
    %c0_9 = arith.constant 0 : index
    %18 = vector.load %arg10[%c0_8, %c0_9] : memref<16x32xf32, #tpu.memory_space<vmem>>, vector<16x32xf32>
    %19 = arith.mulf %17, %8 : vector<16x128xf32>
    %20 = arith.truncf %19 : vector<16x128xf32> to vector<16x128xbf16>
    %c0_10 = arith.constant 0 : index
    %c0_11 = arith.constant 0 : index
    %21 = vector.load %arg7[%c0_10, %c0_11] : memref<128x32xbf16, #tpu.memory_space<vmem>>, vector<128x32xbf16>
    %cst_12 = arith.constant dense<0.000000e+00> : vector<16x32xf32>
    %22 = tpu.matmul %20, %21, %cst_12 {dimension_numbers = #tpu.dot_dimension_numbers<[1], [0], [0], [1], [0, 0, 1, 1], [], []>} : vector<16x128xbf16>, vector<128x32xbf16>, vector<16x32xf32> -> vector<16x32xf32>
    %23 = arith.addf %18, %22 : vector<16x32xf32>
    %c0_13 = arith.constant 0 : index
    %c0_14 = arith.constant 0 : index
    %24 = vector.load %arg10[%c0_13, %c0_14] : memref<16x32xf32, #tpu.memory_space<vmem>>, vector<16x32xf32>
    tpu.vector_store %arg10[%c0_13, %c0_14], %23 {strides = array<i32>} : memref<16x32xf32, #tpu.memory_space<vmem>>, vector<16x32xf32>,
    %c1_i32 = arith.constant 1 : i32
    %25 = arith.cmpi eq, %arg1, %c1_i32 : i32
    %26 = arith.extui %25 : i1 to i32
    %c0_i32_15 = arith.constant 0 : i32
    %27 = arith.cmpi ne, %26, %c0_i32_15 : i32
    scf.if %27 {
      %c0_16 = arith.constant 0 : index
      %c0_17 = arith.constant 0 : index
      %28 = vector.load %arg10[%c0_16, %c0_17] : memref<16x32xf32, #tpu.memory_space<vmem>>, vector<16x32xf32>
      %c0_18 = arith.constant 0 : index
      %c0_19 = arith.constant 0 : index
      %29 = vector.load %arg8[%c0_18, %c0_19] : memref<16x32xf32, #tpu.memory_space<vmem>>, vector<16x32xf32>
      tpu.vector_store %arg8[%c0_18, %c0_19], %28 {strides = array<i32>} : memref<16x32xf32, #tpu.memory_space<vmem>>, vector<16x32xf32>,
    } else {
    }
    return
  }
  func.func @transform_0(%arg0: i32, %arg1: i32) -> (i32, i32) {
    %c0_i32 = arith.constant 0 : i32
    %c0_i32_0 = arith.constant 0 : i32
    return %arg0, %c0_i32 : i32, i32
  }
  func.func @transform_1(%arg0: i32, %arg1: i32) -> (i32, i32) {
    %c0_i32 = arith.constant 0 : i32
    %c0_i32_0 = arith.constant 0 : i32
    %c0_i32_1 = arith.constant 0 : i32
    return %c0_i32, %c0_i32_0 : i32, i32
  }
  func.func @transform_2(%arg0: i32, %arg1: i32) -> (i32, i32) {
    %c0_i32 = arith.constant 0 : i32
    %c0_i32_0 = arith.constant 0 : i32
    %c0_i32_1 = arith.constant 0 : i32
    return %c0_i32, %c0_i32_0 : i32, i32
  }
  func.func @transform_3(%arg0: i32, %arg1: i32) -> (i32, i32) {
    %c0_i32 = arith.constant 0 : i32
    %c0_i32_0 = arith.constant 0 : i32
    %c0_i32_1 = arith.constant 0 : i32
    return %c0_i32, %c0_i32_0 : i32, i32
  }
  func.func @transform_4(%arg0: i32, %arg1: i32) -> (i32, i32, i32) {
    %c0_i32 = arith.constant 0 : i32
    %c0_i32_0 = arith.constant 0 : i32
    %c0_i32_1 = arith.constant 0 : i32
    return %arg1, %c0_i32, %c0_i32_0 : i32, i32, i32
  }
  func.func @transform_5(%arg0: i32, %arg1: i32) -> (i32, i32) {
    %c0_i32 = arith.constant 0 : i32
    %c0_i32_0 = arith.constant 0 : i32
    return %arg1, %c0_i32 : i32, i32
  }
  func.func @transform_6(%arg0: i32, %arg1: i32) -> (i32, i32) {
    %c0_i32 = arith.constant 0 : i32
    %c0_i32_0 = arith.constant 0 : i32
    return %arg0, %c0_i32 : i32, i32
  }
}

</mosaic_0001>

<bundles_post_ra>
// kernel: tpu_custom_call.1
= control target key start
LH: loop header
LB: loop body
LE: loop exit
PB: predicated region body
PF: predicated region fallthrough
CT: control target
= control target key end

     0   :  { %11 = vsyncpa [#allocation5], 0  ;;  %s1190_s21 = smov 0   ;;  %s1192_s22 = smov 0   ;;  %s1353_s0 = inlined_call_operand.vmem [shape: f32[16,32], index: 0, kind: input, shape index: {}]   ;;  %s1354_s1 = inlined_call_operand.vmem [shape: f32[32,8], index: 1, kind: input, shape index: {}]   ;;  %s1355_s2 = inlined_call_operand.vmem [shape: f32[1,4], index: 2, kind: input, shape index: {}]   ;;  %s1356_s3 = inlined_call_operand.vmem [shape: f32[28,32], index: 3, kind: input, shape index: {}]   ;;  %s1357_s4 = inlined_call_operand.vmem [shape: bf16[2,32,256], index: 4, kind: input, shape index: {}]   ;;  %s1358_s5 = inlined_call_operand.vmem [shape: bf16[256,32], index: 5, kind: input, shape index: {}]   ;;  %s1359_s6 = inlined_call_operand.hbm [shape: f32[16,32], index: 6, kind: output, shape index: {}]  }
   0x1   :  { %s1194_s23 = smov 0  }
   0x2 LB: > { %s905_s24 = sadd.s32 4294967295, %s1140_s23   ;;  %s26_s25 = sadd.s32 1, %s1136_s22  ;;  %s1140_s23 = sphi %s1194_s23, %s17_s23   ;;  %s1136_s22 = sphi %s1192_s22, %s1362_s22   ;;  %s1132_s21 = sphi %s1190_s21, %s1361_s21  }
   0x3   : > { %p27_p0 = scmp.ge.s32.totalorder %s26_s25, 2  ;;  %p909_p1 = scmp.ge.s32.totalorder %s1140_s23, 1 }
   0x4   : > { %p247_p2 = scmp.lt.s32.totalorder %s1140_s23, 3 }
   0x5   : > { %s1364_s25 = smov (%p27_p0, %s26_s25), 0 }
   0x6   : > { %p248_p3 = pnand %p909_p1, %p247_p2 }
   0x7   : > { %p288_p4 = scmp.lt.s32.totalorder (!%p248_p3), %s1132_s21, 1  ;;  %s912_s26 = sshll.u32 (!%p248_p3), %s1132_s21, 4 }
   0x8   : > { %251 = sbr.rel (%p248_p3) target bundleno = 1215 (0x4bf), region = 44  ;;  %p294_p5 = scmp.lt.s32.totalorder (!%p248_p3), %s912_s26, 31 }
   0x9   : > { %p914_p6 = scmp.ne.s32.totalorder (!%p248_p3), %s1132_s21, 0 }
   0xf   : > { %s289_s27 = scalar_select %p288_p4, %s1132_s21, 1 }
  0x10   : > { %s1366_s26 = smov (!%p294_p5, %s912_s26), 31  ;;  %304 = sbr.rel (%p914_p6) target bundleno = 705 (0x2c1), region = 48 }
  0x11   : > { %s941_s28 = sshll.u32 %s289_s27, 5  ;;  %s913_s8 = sshll.u32 %s1366_s26, 2  ;;  %v310_v0 = vld [vmem:[%s1354_s1] sm:$0xff] (!%p914_p6)  ;;  %v311_v1 = vld [vmem:[%s1354_s1 + $0x8] sm:$0xff] (!%p914_p6)  ;;  %v312_v2 = vld [vmem:[%s1354_s1 + $0x10] sm:$0xff] (!%p914_p6)  ;;  %vm308_vm0 = vcmask (!%p914_p6), 261120  }
  0x12   : > { %s1217_s7 = scalar_lea.vmem %s1357_s4, %s941_s28  ;;  %s1222_s11 = scalar_lea.vmem %s1358_s5, %s913_s8  ;;  %v1005_v3 = vpack.c.bf16 (!%p914_p6), %v311_v1, %v310_v0  ;;  %v313_v4 = vld [vmem:[%s1354_s1 + $0x18] sm:$0xff] (!%p914_p6)  ;;  %v305_v5 = vld [vmem:[%s1353_s0] sm:$0xff] (!%p914_p6)  ;;  %v306_v6 = vld [vmem:[%s1353_s0 + $0x8] sm:$0xff] (!%p914_p6)  ;;  %vm527_vm1 = vcmask (!%p914_p6), 1043456   ;;  %vm1143_vm2 = vmmov (!%p914_p6), 1   ;;  %v1146_v52 = vmov (!%p914_p6), 0.0  }
  0x13   : > { %v1009_v7 = vpack.c.bf16 (!%p914_p6), %v313_v4, %v312_v2  ;;  %v307_v8 = vpack.c.bf16 (!%p914_p6), %v306_v6, %v305_v5  ;;  %971 = vmatprep.mubr.msk.f32.mxu0 (!%p914_p6), %vm308_vm0, %v305_v5  ;;  %v917_v9 = vld [vmem:[%s1355_s2] ss:$0 sm:$0xff] (!%p914_p6)  ;;  %s1142_s8 = smov (!%p914_p6), 4   ;;  %v517_v29 = vld [vmem:[%s1356_s3 + $0x8] sm:$0xff] (!%p914_p6)  ;;  %v518_v37 = vld [vmem:[%s1356_s3 + $0x10] sm:$0xff] (!%p914_p6)  ;;  %s1144_s18 = smov (!%p914_p6), 8  }
  0x14   : > { %1006 = vmatprep.subr.bf16.mxu0 (!%p914_p6), %v1005_v3  ;;  %401 = vrot.lane.b32.xlu0 (!%p914_p6), %v917_v9, %s1142_s8  ;;  %v516_v28 = vld [vmem:[%s1356_s3] sm:$0xff] (!%p914_p6)  ;;  %v519_v38 = vld [vmem:[%s1356_s3 + $0x18] sm:$0xf] (!%p914_p6)  ;;  %vm1018_vm3 = vmpackc.low (!%p914_p6), %vm527_vm1, %vm1143_vm2  ;;  %s1145_s19 = smov (!%p914_p6), 12   ;;  %s1147_s20 = smov (!%p914_p6), 16   ;;  %vm498_vm6 = vcmask (!%p914_p6), 31744  }
  0x15   : > { %1008 = vmatpush3.bf16.msra.mxu0 (!%p914_p6), %v1005_v3  ;;  %309 = vst.msk [vmem:[#allocation2] sm:$0xff] (!%p914_p6), %vm308_vm0, %v307_v8  ;;  %v1013_v32 = vpack.c.bf16 (!%p914_p6), %v517_v29, %v516_v28  ;;  %v1017_v40 = vpack.c.bf16 (!%p914_p6), %v519_v38, %v518_v37  ;;  %s1148_s26 = smov (!%p914_p6), 20   ;;  %vm501_vm7 = vcmask (!%p914_p6), 64512   ;;  %vm504_vm8 = vcmask (!%p914_p6), 97280  }
  0x16   : > { %1010 = vmatprep.subr.bf16.mxu0 (!%p914_p6), %v1009_v7  ;;  %vm507_vm9 = vcmask (!%p914_p6), 130048   ;;  %vm510_vm10 = vcmask (!%p914_p6), 162816   ;;  %vm513_vm11 = vcmask (!%p914_p6), 195584   ;;  %vm520_vm12 = vcmask (!%p914_p6), 228352  }
  0x17   : > { %1014 = vmatprep.subr.bf16.mxu1 %v1013_v32 }
  0x18   : > { %1016 = vmatpush3.bf16.msra.mxu1 %v1013_v32 }
  0x19   : > { %1012 = vmatpush3.bf16.msra.mxu0 %v1009_v7  ;;  %1019 = vmatprep.subr.msk.bf16.mxu1 %vm1018_vm3, %v1017_v40 }
  0x1c   : > { %972 = vmatmul.mubr.msk.f32.vlgmr.msra.gmra.mrb[0].mxu0 %vm308_vm0, %v306_v6  ;;  %1022 = vmatpush3.bf16.msk.msra.mxu1 %vm1018_vm3, %v1017_v40 }
  0x86   : > { %v402_v12 = vpop.permute.xlu0 %401 }
  0xef   : > { %v1250_v10 = vpop.f32.mrb[0].mxu0 }
  0xf0   : > { %418 = vrot.lane.b32.xlu1 %v1250_v10, %s1142_s8  ;;  %v1254_v11 = vpop.f32.mrb[1].mxu0  ;;  %v1259_v13 = vsub.f32 %v1250_v10, %v402_v12 }
  0xf1   : > { %416 = vrot.lane.b32.xlu0 %v1254_v11, %s1142_s8  ;;  %v1262_v14 = vsub.f32 %v1254_v11, %v402_v12 }
  0xf2   : > { %v425_v15 = vmul.f32 %v1259_v13, %v1259_v13  ;;  %v407_v42 = vand.u32 2147483647, %v1259_v13 }
  0xf3   : > { %v424_v16 = vmul.f32 %v1262_v14, %v1262_v14  ;;  %v406_v44 = vand.u32 2147483647, %v1262_v14 }
  0xf4   : > { %v427_v17 = vmul.f32 0.5, %v425_v15  ;;  %vm409_vm4 = vcmp.le.f32.partialorder %v407_v42, 2.5 }
  0xf5   : > { %v426_v18 = vmul.f32 0.5, %v424_v16  ;;  %vm408_vm5 = vcmp.le.f32.partialorder %v406_v44, 2.5  ;;  %v919_v53 = vsel %vm409_vm4, 1.0, %v1146_v52 }
  0xf6   : > { %v431_v19 = vmul.f32 %v427_v17, %v1259_v13  ;;  %v918_v56 = vsel %vm408_vm5, 1.0, %v1146_v52 }
  0xf7   : > { %v430_v20 = vmul.f32 %v426_v18, %v1262_v14 }
  0xf8   : > { %v433_v21 = vmul.f32 0.33333334, %v431_v19 }
  0xf9   : > { %v432_v22 = vmul.f32 0.33333334, %v430_v20 }
  0xfa   : > { %v437_v23 = vmul.f32 %v433_v21, %v1259_v13 }
  0xfb   : > { %v436_v24 = vmul.f32 %v432_v22, %v1262_v14 }
  0xfc   : > { %v439_v25 = vmul.f32 0.25, %v437_v23 }
  0xfd   : > { %v438_v26 = vmul.f32 0.25, %v436_v24 }
  0xfe   : > { %v443_v27 = vmul.f32 %v439_v25, %v1259_v13 }
  0xff   : > { %v442_v31 = vmul.f32 %v438_v26, %v1262_v14 }
 0x100   : > { %v445_v36 = vmul.f32 0.2, %v443_v27 }
 0x101   : > { %v444_v39 = vmul.f32 0.2, %v442_v31 }
 0x102   : > { %v451_v45 = vmul.f32 %v445_v36, %v1259_v13 }
 0x103   : > { %v450_v46 = vmul.f32 %v444_v39, %v1262_v14 }
 0x104   : > { %v453_v51 = vmul.f32 0.16666667, %v451_v45 }
 0x105   : > { %v452_v54 = vmul.f32 0.16666667, %v450_v46 }
 0x162   : > { %v419_v30 = vpop.permute.xlu1 %418 }
 0x163   : > { %v417_v33 = vpop.permute.xlu0 %416  ;;  %v429_v34 = vmul.f32 %v427_v17, %v419_v30  ;;  %v435_v41 = vmul.f32 %v433_v21, %v419_v30  ;;  %v441_v47 = vmul.f32 %v439_v25, %v419_v30  ;;  %v447_v48 = vmul.f32 %v445_v36, %v419_v30 }
 0x164   : > { %v428_v35 = vmul.f32 %v426_v18, %v417_v33  ;;  %v434_v43 = vmul.f32 %v432_v22, %v417_v33  ;;  %v440_v49 = vmul.f32 %v438_v26, %v417_v33  ;;  %v446_v50 = vmul.f32 %v444_v39, %v417_v33 }
 0x165   : > { %462 = vrot.lane.b32.xlu0 %v429_v34, %s1142_s8  ;;  %v449_v55 = vmul.f32 %v919_v53, %v447_v48  ;;  %v455_v57 = vmul.f32 %v453_v51, %v419_v30  ;;  %v454_v59 = vmul.f32 %v452_v54, %v417_v33  ;;  %v422_v3 = vmul.f32 %v417_v33, %v1262_v14 }
 0x166   : > { %460 = vrot.lane.b32.xlu1 %v428_v35, %s1142_s8  ;;  %v448_v58 = vmul.f32 %v918_v56, %v446_v50  ;;  %v423_v5 = vmul.f32 %v419_v30, %v1259_v13 }
 0x167   : > { %v457_v60 = vmul.f32 %v919_v53, %v455_v57  ;;  %v456_v61 = vmul.f32 %v918_v56, %v454_v59  ;;  %v499_v7 = vsel %vm498_vm6, %v1254_v11, %v422_v3 }
 0x168   : > { %v500_v9 = vsel %vm498_vm6, %v1250_v10, %v423_v5 }
 0x169   : > { %470 = vrot.lane.b32.xlu0 %v435_v41, %s1144_s18 }
 0x16a   : > { %468 = vrot.lane.b32.xlu1 %v434_v43, %s1144_s18 }
 0x16d   : > { %478 = vrot.lane.b32.xlu0 %v441_v47, %s1145_s19 }
 0x16e   : > { %476 = vrot.lane.b32.xlu1 %v440_v49, %s1145_s19 }
 0x171   : > { %486 = vrot.lane.b32.xlu0 %v449_v55, %s1147_s20 }
 0x172   : > { %484 = vrot.lane.b32.xlu1 %v448_v58, %s1147_s20 }
 0x175   : > { %494 = vrot.lane.b32.xlu0 %v457_v60, %s1148_s26 }
 0x176   : > { %492 = vrot.lane.b32.xlu1 %v456_v61, %s1148_s26 }
 0x1d7   : > { %v463_v62 = vpop.permute.xlu0 %462 }
 0x1d8   : > { %v461_v63 = vpop.permute.xlu1 %460  ;;  %v503_v15 = vsel %vm501_vm7, %v500_v9, %v463_v62 }
 0x1d9   : > { %v502_v12 = vsel %vm501_vm7, %v499_v7, %v461_v63 }
 0x1db   : > { %v471_v0 = vpop.permute.xlu0 %470 }
 0x1dc   : > { %v469_v1 = vpop.permute.xlu1 %468  ;;  %v506_v17 = vsel %vm504_vm8, %v503_v15, %v471_v0 }
 0x1dd   : > { %v505_v16 = vsel %vm504_vm8, %v502_v12, %v469_v1 }
 0x1df   : > { %v479_v2 = vpop.permute.xlu0 %478 }
 0x1e0   : > { %v477_v4 = vpop.permute.xlu1 %476  ;;  %v509_v13 = vsel %vm507_vm9, %v506_v17, %v479_v2 }
 0x1e1   : > { %v508_v14 = vsel %vm507_vm9, %v505_v16, %v477_v4 }
 0x1e3   : > { %v487_v6 = vpop.permute.xlu0 %486 }
 0x1e4   : > { %v485_v8 = vpop.permute.xlu1 %484  ;;  %v512_v21 = vsel %vm510_vm10, %v509_v13, %v487_v6 }
 0x1e5   : > { %v511_v19 = vsel %vm510_vm10, %v508_v14, %v485_v8 }
 0x1e7   : > { %v495_v18 = vpop.permute.xlu0 %494 }
 0x1e8   : > { %v493_v20 = vpop.permute.xlu1 %492  ;;  %v515_v23 = vsel %vm513_vm11, %v512_v21, %v495_v18 }
 0x1e9   : > { %v514_v22 = vsel %vm513_vm11, %v511_v19, %v493_v20 }
 0x1ea   : > { %982 = vmatprep.mubr.msk.f32.mxu1 %vm520_vm12, %v514_v22 }
 0x1eb   : > { %983 = vmatmul.mubr.msk.f32.vlgmr.msra.gmra.mrb[0].mxu1 %vm520_vm12, %v515_v23 }
 0x2be   : > { %v984_v11 = vpop.f32.mrb[0].mxu1 }
 0x2bf   : > { %607 = vst.msk [vmem:[#allocation3 + $0x8] sm:$0xff] %vm308_vm0, %v984_v11  ;;  %v597_v10 = vpop.f32.mrb[1].mxu1 }
 0x2c0   : > { %606 = vst.msk [vmem:[#allocation3] sm:$0xff] %vm308_vm0, %v597_v10 }
 0x2c1 PF: > { %v1066_v24 = vld [vmem:[%s1217_s7 + $0x4] ss:$8 sps:$4 sm:$0xff]   ;;  %v1068_v25 = vld [vmem:[%s1217_s7] ss:$8 sps:$4 sm:$0xff]   ;;  %v1149_v26 = vmov 0   ;;  %vm633_vm13 = vcmask 261120  }
 0x2c2   : > { %669 = vmatprep.mubr.bf16.mxu0 %v1149_v26  ;;  %637 = vmatprep.subr.bf16.mxu0 %v1066_v24  ;;  %v1069_v27 = vld [vmem:[%s1217_s7 + $0x14] ss:$8 sps:$4 sm:$0xff]   ;;  %v1071_v28 = vld [vmem:[%s1217_s7 + $0x10] ss:$8 sps:$4 sm:$0xff]   ;;  %v1072_v30 = vld [vmem:[%s1222_s11] sm:$0xff]   ;;  %v1150_v31 = vmov 0.0  }
 0x2c3   : > { %638 = vmatpush1.bf16.msra.mxu0 %v1068_v25  ;;  %985 = vmatprep.subr.bf16.mxu1 %v1150_v31  ;;  %v1073_v32 = vld [vmem:[%s1222_s11 + $0x8] sm:$0xff]   ;;  %v1074_v33 = vld [vmem:[%s1222_s11 + $0x10] sm:$0xff]   ;;  %v1075_v34 = vld [vmem:[%s1222_s11 + $0x18] sm:$0xff]   ;;  %vm1151_vm14 = vmmov 0   ;;  %p936_p7 = scmp.ne.s32.totalorder %s1132_s21, 1 }
 0x2c4   : > { %639 = vmatprep.subr.bf16.mxu0 %v1069_v27  ;;  %986 = vmatpush3.bf16.msra.mxu1 %v1072_v30  ;;  %v1076_v35 = vld [vmem:[%s1222_s11 + $0x20] sm:$0xff]   ;;  %v1077_v36 = vld [vmem:[%s1222_s11 + $0x28] sm:$0xff]   ;;  %v1078_v37 = vld [vmem:[%s1222_s11 + $0x30] sm:$0xff]  }
 0x2c5   : > { %987 = vmatprep.subr.bf16.mxu1 %v1150_v31  ;;  %v1079_v38 = vld [vmem:[%s1222_s11 + $0x38] sm:$0xff]   ;;  %1001 = vmatprep.mubr.msk.bf16.mxu1 %vm1151_vm14, %v1150_v31 }
 0x2c6   : > { %v608_v29 = vld [vmem:[#allocation2] sm:$0xff]  ;;  %v695_v62 = vld [vmem:[#allocation3 + $0x8] sm:$0xff] }
 0x2c7   : > { %640 = vmatpush1.bf16.msra.mxu0 %v1071_v28  ;;  %v694_v60 = vld [vmem:[#allocation3] sm:$0xff] }
 0x2c8   : > { %988 = vmatpush3.bf16.msra.mxu1 %v1073_v32 }
 0x2c9   : > { %989 = vmatprep.subr.bf16.mxu1 %v1150_v31 }
 0x2ca   : > { %927 = vmatmul.mubr.msk.bf16.vlgmr.msra.gmra.mrb[0].mxu0 %vm633_vm13, %v608_v29 }
 0x2cc   : > { %990 = vmatpush3.bf16.msra.mxu1 %v1074_v33 }
 0x2cd   : > { %991 = vmatprep.subr.bf16.mxu1 %v1150_v31 }
 0x2d0   : > { %992 = vmatpush3.bf16.msra.mxu1 %v1075_v34 }
 0x2d1   : > { %993 = vmatprep.subr.bf16.mxu1 %v1150_v31 }
 0x2d4   : > { %994 = vmatpush3.bf16.msra.mxu1 %v1076_v35 }
 0x2d5   : > { %995 = vmatprep.subr.bf16.mxu1 %v1150_v31 }
 0x2d8   : > { %996 = vmatpush3.bf16.msra.mxu1 %v1077_v36 }
 0x2d9   : > { %997 = vmatprep.subr.bf16.mxu1 %v1150_v31 }
 0x2dc   : > { %998 = vmatpush3.bf16.msra.mxu1 %v1078_v37 }
 0x2dd   : > { %999 = vmatprep.subr.bf16.mxu1 %v1150_v31 }
 0x2e0   : > { %1000 = vmatpush3.bf16.msra.mxu1 %v1079_v38 }
 0x39d   : > { %v671_v39 = vpop.f32.mrb[0].mxu0 }
 0x39e   : > { %v680_v40 = vsub.f32 0.0, %v671_v39  ;;  %v673_v41 = vpop.f32.mrb[1].mxu0 }
 0x39f   : > { %v675_v42 = vpop.f32.mrb[2].mxu0 }
 0x3a0   : > { %v682_v43 = vmin.f32 %v680_v40, 80.0  ;;  %v681_v44 = vsub.f32 0.0, %v675_v42  ;;  %v677_v45 = vpop.f32.mrb[3].mxu0 }
 0x3a2   : > { %v684_v46 = vmul.f32 1.442695, %v682_v43  ;;  %v683_v47 = vmin.f32 %v681_v44, 80.0 }
 0x3a4   : > { %1080 = vpow2.f32 %v684_v46  ;;  %v686_v48 = vmul.f32 1.442695, %v683_v47 }
 0x3a6   : > { %1082 = vpow2.f32 %v686_v48 }
 0x3ae   : > { %v1081_v49 = vpop.eup %1080 }
 0x3af   : > { %v688_v50 = vadd.f32 1.0, %v1081_v49 }
 0x3b0   : > { %v1083_v51 = vpop.eup %1082 }
 0x3b1   : > { %1084 = vrcp.f32 %v688_v50  ;;  %v689_v52 = vadd.f32 1.0, %v1083_v51 }
 0x3b3   : > { %1086 = vrcp.f32 %v689_v52 }
 0x3bb   : > { %v1085_v53 = vpop.eup %1084 }
 0x3bc   : > { %v692_v54 = vmul.f32 %v1085_v53, %v671_v39 }
 0x3bd   : > { %v1087_v55 = vpop.eup %1086 }
 0x3be   : > { %v696_v56 = vmul.f32 %v692_v54, %v673_v41  ;;  %v693_v57 = vmul.f32 %v1087_v55, %v675_v42 }
 0x3c0   : > { %v697_v58 = vmul.f32 %v693_v57, %v677_v45 }
 0x3c2   : > { %v698_v59 = vpack.c.bf16 %v697_v58, %v696_v56 }
 0x3c4   : > { %1002 = vmatmul.mubr.bf16.vlgmr.msra.gmra.mrb[0].mxu1 %v698_v59 }
 0x496   : > { %811 = sbr.rel (%p936_p7) target bundleno = 1189 (0x4a5), region = 52 }
 0x497   : > { %v797_v61 = vpop.f32.mrb[0].mxu1 }
 0x498   : > { %v804_v63 = vadd.f32 %v797_v61, %v694_v60  ;;  %v1003_v0 = vpop.f32.mrb[1].mxu1 }
 0x499   : > { %v800_v1 = vpop.f32.mrb[2].mxu1 }
 0x49a   : > { %806 = vst.msk [vmem:[#allocation3] sm:$0xff] %vm633_vm13, %v804_v63  ;;  %v805_v2 = vadd.f32 %v800_v1, %v695_v62  ;;  %v1004_v3 = vpop.f32.mrb[3].mxu1 }
 0x49c   : > { %807 = vst.msk [vmem:[#allocation3 + $0x8] sm:$0xff] %vm633_vm13, %v805_v2 }
 0x4a1   : > { %v812_v4 = vld [vmem:[#allocation3] sm:$0xff] }
 0x4a2   : > { %814 = vst.msk [vmem:[#allocation4] sm:$0xff] %vm633_vm13, %v812_v4 }
 0x4a3   : > { %v813_v5 = vld [vmem:[#allocation3 + $0x8] sm:$0xff] }
 0x4a4   : > { %815 = vst.msk [vmem:[#allocation4 + $0x8] sm:$0xff] %vm633_vm13, %v813_v5 }
 0x4a5 PF: > { %p1318_p8 = scmp.eq.s32.totalorder %s905_s24, 1  ;;  %s1152_s11 = smov [#allocation4]  }
 0x4a6   : > { %s825_s27 = sshll.u32 %s1152_s11, 4  ;;  %s826_s27 = int_to_ptr.vmem [resolvable:$true] %s825_s27 }
 0x4a7   : > { %s1088_s28 = scalar_lea.vmem %s826_s27, 256  ;;  %p1095_p12 = scmp.lt.s32.totalorder %s826_s27, %s826_s27 }
 0x4a8   : > { %p1089_p9 = scmp.ne.s32.totalorder %s826_s27, %s1088_s28  ;;  %p1096_p13 = scmp.lt.s32.totalorder %s1088_s28, %s1088_s28 }
 0x4aa   : > { %p1090_p10 = pnand %p1089_p9, %p1318_p8  ;;  %p1097_p0 = por %p1096_p13, %p1095_p12 }
 0x4ac   : > { %p1091_p11 = pneg %p1090_p10 }
 0x4ae   : > { %p1098_p1 = pnand %p1097_p0, %p1091_p11 }
 0x4b0   : > { %1101 = shalt.err (!%p1098_p1)
}
 0x4b1   : > { %s1102_s24 = scalar_lea.hbm %s1359_s6, 256 }
 0x4b2   : > { %p1103_p2 = scmp.ne.s32.totalorder %s1359_s6, %s1102_s24  ;;  %p1108_p5 = scmp.lt.u32.totalorder %s1102_s24, %s1359_s6 }
 0x4b4   : > { %p1104_p3 = pnand %p1103_p2, %p1318_p8 }
 0x4b6   : > { %p1105_p4 = pneg %p1104_p3 }
 0x4b8   : > { %p1110_p6 = pnand %p1108_p5, %p1105_p4 }
 0x4ba   : > { %1113 = shalt.err (!%p1110_p6)
}
 0x4bb   : > { %s1153_s12 = smov 128   ;;  %s1154_s13 = smov 8  }
 0x4bc   : > { %1024 = dma.vmem_to_hbm [thread:$0]  (%p1318_p8), %s826_s27, 256, %s1359_s6, [#allocation5], %s1153_s12, %s1153_s12, %s1154_s13  }
 0x4bd   : > { %1127 = dma.done.wait (%p1318_p8), [#allocation5], 256  }
 0x4be   : > { %1129 = vsyncadd (%p1318_p8), [#allocation5], 4294967040 }
 0x4bf PF: > { %s17_s23 = sadd.s32 1, %s1140_s23   ;;  %s1361_s21 = smov %s1136_s22 }
 0x4c0   : > { %p14_p7 = scmp.ge.s32.totalorder %s17_s23, 4   ;;  %s1362_s22 = smov %s1364_s25 }
 0x4c2   :  { %16 = sbr.rel (!%p14_p7) target bundleno = 2 (0x2), region = 86 }
 0x4c9   :  { %841 = vsyncpa [#allocation5], 1 }
 0x4ca   :  { %843 = vsyncpa [#allocation5 + $0x1], 1 }

</bundles_post_ra>
